<compile_context>
chip_gen: v7x
topology: tpu7x:2x2x1
jax: 0.10.0
libtpu: 0.0.40
codegen_flags: <defaults>
</compile_context>

<pallas_src>
import functools

import numpy as np
import jax
import jax.numpy as jnp
from jax.experimental import pallas as pl
from jax.experimental.pallas import tpu as pltpu


def _yelp_item_kernel(x_ref, emb_tbl_ref, cate_tbl_ref, out_ref, *, prefix, d):
    x_i32 = x_ref[...]                               # (TB, 5 + n_cate) int32
    tb = x_i32.shape[0]
    v = emb_tbl_ref.shape[0]

    # Fused one-hot over the concatenated vocabulary, built with EXACT integer
    # compares: onehot[b, col] = 1 iff col == prefix[f] + x[b, f] for one of
    # the 5 index fields.  Field ranges are disjoint, so the sum stays 0/1.
    # (No matmul here => no bf16-rounding hazard for large vocab indices.)
    col = jax.lax.broadcasted_iota(jnp.int32, (tb, v), 1)
    onehot_f32 = (col == (x_i32[:, 0:1] + prefix[0])).astype(jnp.float32)
    for f in range(1, 5):
        onehot_f32 = onehot_f32 + (
            col == (x_i32[:, f:f + 1] + prefix[f])).astype(jnp.float32)
    onehot = onehot_f32.astype(jnp.bfloat16)         # exact 0/1 in bf16

    # Already-concatenated (TB, 6D) slab:
    #   block-diagonal embedding lookup  +  category projection (last D cols).
    y = jnp.dot(onehot, emb_tbl_ref[...], preferred_element_type=jnp.float32)
    # cate_tbl has exactly-zero rows for the 5 index columns, so the (possibly
    # bf16-rounded) index values contribute exactly 0; the 0/1 category values
    # are exact in bf16.
    x_bf16 = x_i32.astype(jnp.float32).astype(jnp.bfloat16)
    y = y + jnp.dot(x_bf16, cate_tbl_ref[...], preferred_element_type=jnp.float32)

    # Sigmoid only affects the last D (cate) lanes; single lane-dense store.
    # TODO(synk): if a bundle dump ever shows the EUP on the critical path,
    # restrict the sigmoid to the trailing 128-lane vreg instead of masking.
    lane = jax.lax.broadcasted_iota(jnp.int32, y.shape, 1)
    out_ref[...] = jnp.where(lane >= 5 * d, jax.nn.sigmoid(y), y).astype(out_ref.dtype)


def prepare_yelp_item_params(params, config, *, table_dtype=jnp.bfloat16):
    """One-time host-side packing of the tables into fused matmul operands."""
    D = config["embedding_dim"]
    sizes = [config["num_city"], config["num_state"], config["num_postal_code"],
             config["num_item_stars"], config["num_item_review_count"]]
    n_cate = config["num_categories"]
    c = 5 + n_cate
    prefix = np.concatenate([[0], np.cumsum(sizes)]).astype(np.int64)
    V = int(prefix[-1])

    # Block-diagonal embedding table: rows of field f land in cols [f*D,(f+1)*D)
    # -> one one-hot matmul produces the already-concatenated embeddings.
    emb_tbl = np.zeros((V, 6 * D), np.float32)
    tables = [params["city"], params["state"], params["code"],
              params["stars"], params["count"]]
    for f, t in enumerate(tables):
        lo, hi = int(prefix[f]), int(prefix[f + 1])
        emb_tbl[lo:hi, f * D:(f + 1) * D] = np.asarray(t, np.float32)

    # Category projection packed against the FULL packed input row: the first
    # 5 (index) rows are zero so index values contribute exactly 0; w_cate^T
    # occupies the last D output columns (no per-call transpose).
    cate_tbl = np.zeros((c, 6 * D), np.float32)
    cate_tbl[5:, 5 * D:6 * D] = np.asarray(params["w_cate"], np.float32).T

    return dict(
        emb_tbl=jnp.asarray(emb_tbl, table_dtype),
        cate_tbl=jnp.asarray(cate_tbl, table_dtype),
        prefix=tuple(int(p) for p in prefix[:5]),
        D=D, n_cate=n_cate, V=V,
    )


def _pick_batch_tile(B, block_b):
    """Large batch tile (amortizes ~0.35us/step grid overhead), multiple of 8
    when possible, and >=2 grid steps when the batch allows so v7x's second
    TensorCore gets work through the 'parallel' batch axis."""
    if B > block_b:
        return block_b
    if B >= 16 and B % 16 == 0:
        return B // 2
    return B


def yelp_item_forward(x, prep, *, block_b=2048):
    """x: (B, 5 + n_cate) packed int input (first 5 cols indices, rest multi-hot)."""
    if x.dtype != jnp.int32:
        x = x.astype(jnp.int32)          # indices / multi-hot are small exact ints
    B, C = x.shape
    D, n_cate, V = prep["D"], prep["n_cate"], prep["V"]
    assert C == 5 + n_cate

    TB = _pick_batch_tile(B, block_b)
    grid = (pl.cdiv(B, TB),)

    flops = 2 * B * (V + C) * 6 * D
    transcendentals = B * 6 * D
    tbl_bytes = (prep["emb_tbl"].size * prep["emb_tbl"].dtype.itemsize
                 + prep["cate_tbl"].size * prep["cate_tbl"].dtype.itemsize)
    bytes_accessed = B * C * 4 + B * 6 * D * 4 + tbl_bytes

    # TODO(synk): for very large vocabularies (V*6D table approaching v7x's
    # 64 MiB VMEM) switch the big field to a scalar-prefetch/DMA gather or add
    # an 'arbitrary' vocab grid axis + accumulator instead of a resident table,
    # and single-buffer the constant-index tables.
    return pl.pallas_call(
        functools.partial(_yelp_item_kernel, prefix=prep["prefix"], d=D),
        out_shape=jax.ShapeDtypeStruct((B, 6 * D), jnp.float32),
        grid=grid,
        in_specs=[
            pl.BlockSpec((TB, C), lambda i: (i, 0)),          # packed x block
            pl.BlockSpec((V, 6 * D), lambda i: (0, 0)),       # resident emb table
            pl.BlockSpec((C, 6 * D), lambda i: (0, 0)),       # resident cate table
        ],
        out_specs=pl.BlockSpec((TB, 6 * D), lambda i: (i, 0)),
        compiler_params=pltpu.CompilerParams(
            dimension_semantics=("parallel",),
            vmem_limit_bytes=32 * 1024 * 1024),
        cost_estimate=pl.CostEstimate(flops=flops,
                                      transcendentals=transcendentals,
                                      bytes_accessed=bytes_accessed),
    )(x, prep["emb_tbl"], prep["cate_tbl"])


def _reference_forward(x, params):
    idx = x[:, :5].astype(jnp.int32)
    cate = x[:, 5:].astype(jnp.float32)
    city = params["city"][idx[:, 0]]
    state = params["state"][idx[:, 1]]
    code = params["code"][idx[:, 2]]
    stars = params["stars"][idx[:, 3]]
    count = params["count"][idx[:, 4]]
    cate_emb = jax.nn.sigmoid(cate @ params["w_cate"].T)
    return jnp.concatenate((city, state, code, stars, count, cate_emb), axis=1)


if __name__ == "__main__":
    # Small config consistent with the module's __init__.
    config = dict(num_city=16, num_state=8, num_postal_code=16,
                  num_item_stars=8, num_item_review_count=8,
                  num_categories=64, embedding_dim=32)
    B = 8
    D = config["embedding_dim"]
    n_cate = config["num_categories"]

    key = jax.random.PRNGKey(0)
    keys = jax.random.split(key, 8)

    # Deterministic synthetic parameters (torch Embedding default ~ N(0,1)).
    params = {
        "city":  jax.random.normal(keys[0], (config["num_city"], D), jnp.float32),
        "state": jax.random.normal(keys[1], (config["num_state"], D), jnp.float32),
        "code":  jax.random.normal(keys[2], (config["num_postal_code"], D), jnp.float32),
        "stars": jax.random.normal(keys[3], (config["num_item_stars"], D), jnp.float32),
        "count": jax.random.normal(keys[4], (config["num_item_review_count"], D), jnp.float32),
        # torch Linear weight layout: (out_features=D, in_features=n_cate)
        "w_cate": jax.random.normal(keys[5], (D, n_cate), jnp.float32) * 0.1,
    }

    # Packed input x: first 5 columns are indices, remaining are multi-hot cates.
    idx_cols = jnp.stack([
        jax.random.randint(keys[6], (B,), 0, config["num_city"]),
        jax.random.randint(jax.random.fold_in(keys[6], 1), (B,), 0, config["num_state"]),
        jax.random.randint(jax.random.fold_in(keys[6], 2), (B,), 0, config["num_postal_code"]),
        jax.random.randint(jax.random.fold_in(keys[6], 3), (B,), 0, config["num_item_stars"]),
        jax.random.randint(jax.random.fold_in(keys[6], 4), (B,), 0, config["num_item_review_count"]),
    ], axis=1).astype(jnp.int32)
    cate_cols = jax.random.bernoulli(keys[7], 0.3, (B, n_cate)).astype(jnp.int32)
    x = jnp.concatenate([idx_cols, cate_cols], axis=1)       # (B, 5 + n_cate) int32

    # One-time host-side packing of the tables (bf16, no per-call transposes).
    prep = prepare_yelp_item_params(params, config)

    out = yelp_item_forward(x, prep)
    out = jax.block_until_ready(out)
    assert out.shape == (B, 6 * D)

    # Tight check against the same bf16-quantized weights the kernel uses.
    params_q = {k: v.astype(jnp.bfloat16).astype(jnp.float32)
                for k, v in params.items()}
    ref_q = _reference_forward(x, params_q)
    assert jnp.allclose(out, ref_q, atol=2e-3, rtol=2e-3), \
        float(jnp.max(jnp.abs(out - ref_q)))

    # Loose check against the original f32 weights (bf16 table quantization).
    ref = _reference_forward(x, params)
    assert jnp.allclose(out, ref, atol=3e-2, rtol=3e-2), \
        float(jnp.max(jnp.abs(out - ref)))

    print("KERNEL_OK")
</pallas_src>

<mosaic_0001>
module attributes {stable_mosaic.version = 11 : i64} {
  func.func @_yelp_item_kernel(%arg0: i32, %arg1: memref<8x69xi32, #tpu.memory_space<vmem>>, %arg2: memref<56x192xbf16, #tpu.memory_space<vmem>>, %arg3: memref<69x192xbf16, #tpu.memory_space<vmem>>, %arg4: memref<8x192xf32, #tpu.memory_space<vmem>>) attributes {dimension_semantics = [#tpu.dimension_semantics<parallel>], iteration_bounds = array<i64: 1>, scalar_prefetch = 0 : i64, scratch_operands = 0 : i64, tpu.core_type = #tpu.core_type<tc>, window_params = [{transform_indices = @transform_0, window_bounds = array<i64: 8, 69>}, {pipeline_mode = #tpu.pipeline_mode<synchronous>, transform_indices = @transform_1, window_bounds = array<i64: 56, 192>}, {pipeline_mode = #tpu.pipeline_mode<synchronous>, transform_indices = @transform_2, window_bounds = array<i64: 69, 192>}, {transform_indices = @transform_3, window_bounds = array<i64: 8, 192>}]} {
    %c0 = arith.constant 0 : index
    %c0_0 = arith.constant 0 : index
    %0 = vector.load %arg1[%c0, %c0_0] : memref<8x69xi32, #tpu.memory_space<vmem>>, vector<8x69xi32>
    %1 = tpu.iota {dimensions = array<i32: 1>} : vector<8x56xi32>
    %2 = vector.extract_strided_slice %0 {offsets = [0, 0], sizes = [8, 1], strides = [1, 1]} : vector<8x69xi32> to vector<8x1xi32>
    %c0_i32 = arith.constant 0 : i32
    %3 = vector.broadcast %c0_i32 : i32 to vector<8x1xi32>
    %4 = arith.addi %2, %3 : vector<8x1xi32>
    %5 = vector.broadcast %4 : vector<8x1xi32> to vector<8x56xi32>
    %6 = arith.cmpi eq, %1, %5 : vector<8x56xi32>
    %7 = arith.extui %6 : vector<8x56xi1> to vector<8x56xi32>
    %8 = arith.sitofp %7 : vector<8x56xi32> to vector<8x56xf32>
    %9 = vector.extract_strided_slice %0 {offsets = [0, 1], sizes = [8, 1], strides = [1, 1]} : vector<8x69xi32> to vector<8x1xi32>
    %c16_i32 = arith.constant 16 : i32
    %10 = vector.broadcast %c16_i32 : i32 to vector<8x1xi32>
    %11 = arith.addi %9, %10 : vector<8x1xi32>
    %12 = vector.broadcast %11 : vector<8x1xi32> to vector<8x56xi32>
    %13 = arith.cmpi eq, %1, %12 : vector<8x56xi32>
    %14 = arith.extui %13 : vector<8x56xi1> to vector<8x56xi32>
    %15 = arith.sitofp %14 : vector<8x56xi32> to vector<8x56xf32>
    %16 = arith.addf %8, %15 : vector<8x56xf32>
    %17 = vector.extract_strided_slice %0 {offsets = [0, 2], sizes = [8, 1], strides = [1, 1]} : vector<8x69xi32> to vector<8x1xi32>
    %c24_i32 = arith.constant 24 : i32
    %18 = vector.broadcast %c24_i32 : i32 to vector<8x1xi32>
    %19 = arith.addi %17, %18 : vector<8x1xi32>
    %20 = vector.broadcast %19 : vector<8x1xi32> to vector<8x56xi32>
    %21 = arith.cmpi eq, %1, %20 : vector<8x56xi32>
    %22 = arith.extui %21 : vector<8x56xi1> to vector<8x56xi32>
    %23 = arith.sitofp %22 : vector<8x56xi32> to vector<8x56xf32>
    %24 = arith.addf %16, %23 : vector<8x56xf32>
    %25 = vector.extract_strided_slice %0 {offsets = [0, 3], sizes = [8, 1], strides = [1, 1]} : vector<8x69xi32> to vector<8x1xi32>
    %c40_i32 = arith.constant 40 : i32
    %26 = vector.broadcast %c40_i32 : i32 to vector<8x1xi32>
    %27 = arith.addi %25, %26 : vector<8x1xi32>
    %28 = vector.broadcast %27 : vector<8x1xi32> to vector<8x56xi32>
    %29 = arith.cmpi eq, %1, %28 : vector<8x56xi32>
    %30 = arith.extui %29 : vector<8x56xi1> to vector<8x56xi32>
    %31 = arith.sitofp %30 : vector<8x56xi32> to vector<8x56xf32>
    %32 = arith.addf %24, %31 : vector<8x56xf32>
    %33 = vector.extract_strided_slice %0 {offsets = [0, 4], sizes = [8, 1], strides = [1, 1]} : vector<8x69xi32> to vector<8x1xi32>
    %c48_i32 = arith.constant 48 : i32
    %34 = vector.broadcast %c48_i32 : i32 to vector<8x1xi32>
    %35 = arith.addi %33, %34 : vector<8x1xi32>
    %36 = vector.broadcast %35 : vector<8x1xi32> to vector<8x56xi32>
    %37 = arith.cmpi eq, %1, %36 : vector<8x56xi32>
    %38 = arith.extui %37 : vector<8x56xi1> to vector<8x56xi32>
    %39 = arith.sitofp %38 : vector<8x56xi32> to vector<8x56xf32>
    %40 = arith.addf %32, %39 : vector<8x56xf32>
    %41 = arith.truncf %40 : vector<8x56xf32> to vector<8x56xbf16>
    %c0_1 = arith.constant 0 : index
    %c0_2 = arith.constant 0 : index
    %42 = vector.load %arg2[%c0_1, %c0_2] : memref<56x192xbf16, #tpu.memory_space<vmem>>, vector<56x192xbf16>
    %cst = arith.constant dense<0.000000e+00> : vector<8x192xf32>
    %43 = tpu.matmul %41, %42, %cst {dimension_numbers = #tpu.dot_dimension_numbers<[1], [0], [0], [1], [0, 0, 1, 1], [], []>} : vector<8x56xbf16>, vector<56x192xbf16>, vector<8x192xf32> -> vector<8x192xf32>
    %44 = arith.sitofp %0 : vector<8x69xi32> to vector<8x69xf32>
    %45 = arith.truncf %44 : vector<8x69xf32> to vector<8x69xbf16>
    %c0_3 = arith.constant 0 : index
    %c0_4 = arith.constant 0 : index
    %46 = vector.load %arg3[%c0_3, %c0_4] : memref<69x192xbf16, #tpu.memory_space<vmem>>, vector<69x192xbf16>
    %cst_5 = arith.constant dense<0.000000e+00> : vector<8x192xf32>
    %47 = tpu.matmul %45, %46, %cst_5 {dimension_numbers = #tpu.dot_dimension_numbers<[1], [0], [0], [1], [0, 0, 1, 1], [], []>} : vector<8x69xbf16>, vector<69x192xbf16>, vector<8x192xf32> -> vector<8x192xf32>
    %48 = arith.addf %43, %47 : vector<8x192xf32>
    %49 = tpu.iota {dimensions = array<i32: 1>} : vector<8x192xi32>
    %c160_i32 = arith.constant 160 : i32
    %50 = vector.broadcast %c160_i32 : i32 to vector<8x192xi32>
    %51 = arith.cmpi sge, %49, %50 : vector<8x192xi32>
    %52 = arith.negf %48 : vector<8x192xf32>
    %53 = math.exp %52 : vector<8x192xf32>
    %cst_6 = arith.constant 1.000000e+00 : f32
    %54 = vector.broadcast %cst_6 : f32 to vector<8x192xf32>
    %55 = arith.addf %54, %53 : vector<8x192xf32>
    %56 = arith.divf %54, %55 : vector<8x192xf32>
    %57 = arith.select %51, %56, %48 : vector<8x192xi1>, vector<8x192xf32>
    %c0_7 = arith.constant 0 : index
    %c0_8 = arith.constant 0 : index
    %58 = vector.load %arg4[%c0_7, %c0_8] : memref<8x192xf32, #tpu.memory_space<vmem>>, vector<8x192xf32>
    tpu.vector_store %arg4[%c0_7, %c0_8], %57 {strides = array<i32>} : memref<8x192xf32, #tpu.memory_space<vmem>>, vector<8x192xf32>,
    return
  }
  func.func @transform_0(%arg0: i32) -> (i32, i32) {
    %c0_i32 = arith.constant 0 : i32
    %c0_i32_0 = arith.constant 0 : i32
    return %arg0, %c0_i32 : i32, i32
  }
  func.func @transform_1(%arg0: i32) -> (i32, i32) {
    %c0_i32 = arith.constant 0 : i32
    %c0_i32_0 = arith.constant 0 : i32
    %c0_i32_1 = arith.constant 0 : i32
    return %c0_i32, %c0_i32_0 : i32, i32
  }
  func.func @transform_2(%arg0: i32) -> (i32, i32) {
    %c0_i32 = arith.constant 0 : i32
    %c0_i32_0 = arith.constant 0 : i32
    %c0_i32_1 = arith.constant 0 : i32
    return %c0_i32, %c0_i32_0 : i32, i32
  }
  func.func @transform_3(%arg0: i32) -> (i32, i32) {
    %c0_i32 = arith.constant 0 : i32
    %c0_i32_0 = arith.constant 0 : i32
    return %arg0, %c0_i32 : i32, i32
  }
}

</mosaic_0001>

<bundles_post_ra>
// kernel: tpu_custom_call.1
= control target key start
LH: loop header
LB: loop body
LE: loop exit
PB: predicated region body
PF: predicated region fallthrough
CT: control target
= control target key end

     0   :  { %8 = vsyncpa [#allocation3], 0  ;;  %s605_s0 = inlined_call_operand.hbm [shape: s32[8,69], index: 0, kind: input, shape index: {}]   ;;  %s606_s1 = inlined_call_operand.hbm [shape: bf16[56,192], index: 1, kind: input, shape index: {}]   ;;  %s607_s2 = inlined_call_operand.hbm [shape: bf16[69,192], index: 2, kind: input, shape index: {}]   ;;  %s608_s3 = inlined_call_operand.hbm [shape: f32[8,192], index: 3, kind: output, shape index: {}]  }
   0x1   :  { %9 = vsyncpa [#allocation6], 0 }
   0x2   :  { %10 = vsyncpa [#allocation4], 0  ;;  %s510_s12 = smov [#allocation5]   ;;  %s416_s16 = scalar_lea.hbm %s606_s1, 896 }
   0x3   :  { %s26_s13 = sshll.u32 %s510_s12, 4  ;;  %p417_p0 = scmp.ne.s32.totalorder %s606_s1, %s416_s16  ;;  %s27_s13 = int_to_ptr.vmem [resolvable:$true] %s26_s13 }
   0x4   :  { %p420_p1 = scmp.lt.u32.totalorder %s416_s16, %s606_s1 }
   0x6   :  { %p422_p2 = pnand %p420_p1, %p417_p0 }
   0x8   :  { %425 = shalt.err (!%p422_p2)
}
   0x9   :  { %s426_s21 = scalar_lea.vmem %s27_s13, 896  ;;  %p431_p4 = scmp.lt.s32.totalorder %s27_s13, %s27_s13 }
   0xa   :  { %p427_p3 = scmp.ne.s32.totalorder %s27_s13, %s426_s21  ;;  %p432_p5 = scmp.lt.s32.totalorder %s426_s21, %s426_s21 }
   0xc   :  { %p433_p6 = por %p432_p5, %p431_p4 }
   0xe   :  { %p434_p7 = pnand %p433_p6, %p427_p3 }
  0x10   :  { %437 = shalt.err (!%p434_p7)
}
  0x11   :  { %s511_s22 = smov 128   ;;  %s512_s23 = smov 8  }
  0x12   :  { %32 = dma.hbm_to_vmem [thread:$0]  %s606_s1, 896, %s27_s13, [#allocation6], %s511_s22, %s511_s22, %s512_s23  }
  0x13   :  { %s513_s26 = smov [#allocation2]   ;;  %s514_s28 = smov [#allocation7]  }
  0x14   :  { %s17_s27 = sshll.u32 %s513_s26, 4  ;;  %s38_s29 = sshll.u32 %s514_s28, 4  ;;  %s18_s27 = int_to_ptr.vmem [resolvable:$true] %s17_s27  ;;  %s39_s29 = int_to_ptr.vmem [resolvable:$true] %s38_s29 }
  0x15   :  { %s438_s5 = scalar_lea.hbm %s605_s0, 128 }
  0x16   :  { %p439_p8 = scmp.ne.s32.totalorder %s605_s0, %s438_s5  ;;  %p442_p9 = scmp.lt.u32.totalorder %s438_s5, %s605_s0 }
  0x18   :  { %p444_p10 = pnand %p442_p9, %p439_p8 }
  0x1a   :  { %447 = shalt.err (!%p444_p10)
}
  0x1b   :  { %s448_s1 = scalar_lea.vmem %s18_s27, 128  ;;  %p453_p12 = scmp.lt.s32.totalorder %s18_s27, %s18_s27 }
  0x1c   :  { %p449_p11 = scmp.ne.s32.totalorder %s18_s27, %s448_s1  ;;  %p454_p13 = scmp.lt.s32.totalorder %s448_s1, %s448_s1 }
  0x1e   :  { %p455_p0 = por %p454_p13, %p453_p12 }
  0x20   :  { %p456_p1 = pnand %p455_p0, %p449_p11 }
  0x22   :  { %459 = shalt.err (!%p456_p1)
}
  0x23   :  { %20 = dma.hbm_to_vmem [thread:$0]  %s605_s0, 128, %s18_s27, [#allocation3]  }
  0x24   :  { %s460_s14 = scalar_lea.hbm %s607_s2, 1152 }
  0x25   :  { %p461_p2 = scmp.ne.s32.totalorder %s607_s2, %s460_s14  ;;  %p464_p3 = scmp.lt.u32.totalorder %s460_s14, %s607_s2 }
  0x27   :  { %p466_p4 = pnand %p464_p3, %p461_p2 }
  0x29   :  { %469 = shalt.err (!%p466_p4)
}
  0x2a   :  { %s470_s19 = scalar_lea.vmem %s39_s29, 1152  ;;  %p475_p6 = scmp.lt.s32.totalorder %s39_s29, %s39_s29 }
  0x2b   :  { %p471_p5 = scmp.ne.s32.totalorder %s39_s29, %s470_s19  ;;  %p476_p7 = scmp.lt.s32.totalorder %s470_s19, %s470_s19 }
  0x2d   :  { %p477_p8 = por %p476_p7, %p475_p6 }
  0x2f   :  { %p478_p9 = pnand %p477_p8, %p471_p5 }
  0x31   :  { %481 = shalt.err (!%p478_p9)
}
  0x32   :  { %44 = dma.hbm_to_vmem [thread:$0]  %s607_s2, 1152, %s39_s29, [#allocation6], %s511_s22, %s511_s22, %s512_s23  }
  0x33   :  { %504 = dma.done.wait [#allocation3], 128  }
  0x34   :  { %505 = vsyncadd [#allocation3], 4294967168 }
  0x35   :  { %506 = dma.done.wait [#allocation6], 2048  }
  0x36   :  { %507 = vsyncadd [#allocation6], 4294965248  ;;  %v515_v0 = vmov 0   ;;  %v516_v1 = vmov 2   ;;  %v585_v2 = vld [vmem:[#allocation2] sm:$0xff]  ;;  %v517_v11 = vmov 1   ;;  %v56_v38 = vlaneseq }
  0x37   :  { %381 = vset.pattern.permute.xlu0 %v515_v0  ;;  %383 = vset.pattern.permute.xlu1 %v516_v1  ;;  %v72_v3 = vadd.s32 24, %v585_v2  ;;  %v387_v4 = vld [vmem:[#allocation7 + $0x4] ss:$8 sps:$4 sm:$0xff]   ;;  %v64_v5 = vadd.s32 16, %v585_v2  ;;  %v389_v6 = vld [vmem:[#allocation7] ss:$8 sps:$4 sm:$0xff]   ;;  %v104_v34 = vcvt.s32.f32 %v585_v2 }
  0x38   :  { %206 = vmatprep.mubr.bf16.mxu1 %v515_v0  ;;  %293 = vmatprep.mubr.bf16.mxu0 %v515_v0  ;;  %v390_v7 = vld [vmem:[#allocation7 + $0x14] ss:$8 sps:$4 sm:$0xff]   ;;  %v392_v8 = vld [vmem:[#allocation7 + $0x10] ss:$8 sps:$4 sm:$0xff]   ;;  %v80_v9 = vadd.s32 40, %v585_v2  ;;  %v518_v14 = vmov 3  }
  0x39   :  { %59 = vperm.xlu0 %381, %v585_v2   ;;  %74 = vperm.xlu1 %383, %v72_v3   ;;  %v393_v10 = vld [vmem:[#allocation5 + $0x4] ss:$8 sps:$4 sm:$0xff]   ;;  %v397_v13 = vld [vmem:[#allocation5] ss:$8 sps:$4 sm:$0xff]   ;;  %v399_v15 = vld [vmem:[#allocation5 + $0x14] ss:$8 sps:$4 sm:$0xff]   ;;  %v105_v37 = vpack.c.bf16 %v104_v34, %v104_v34 }
  0x3a   :  { %174 = vmatprep.subr.bf16.mxu1 %v387_v4  ;;  %v395_v12 = vld [vmem:[#allocation7 + $0x24] ss:$8 sps:$4 sm:$0xff]   ;;  %261 = vmatprep.subr.bf16.mxu0 %v393_v10  ;;  %vm164_vm0 = vcmask 1041408   ;;  %v88_v16 = vadd.s32 48, %v585_v2  ;;  %v398_v17 = vld [vmem:[#allocation7 + $0x20] ss:$8 sps:$4 sm:$0xff]  }
  0x3b   :  { %175 = vmatpush1.bf16.msra.mxu1 %v389_v6  ;;  %262 = vmatpush1.bf16.msra.mxu0 %v397_v13  ;;  %v403_v18 = vld [vmem:[#allocation5 + $0x10] ss:$8 sps:$4 sm:$0xff]   ;;  %v401_v19 = vld [vmem:[#allocation7 + $0x34] ss:$8 sps:$4 sm:$0xff]   ;;  %vm165_vm1 = vcmask 1042432   ;;  %v519_v20 = vmov 65535  }
  0x3c   :  { %176 = vmatprep.subr.bf16.mxu1 %v390_v7  ;;  %263 = vmatprep.subr.bf16.mxu0 %v399_v15  ;;  %v166_v21 = vsel %vm164_vm0, 4294967295, %v519_v20  ;;  %v405_v22 = vld [vmem:[#allocation5 + $0x24] ss:$8 sps:$4 sm:$0xff]   ;;  %v114_v23 = vld [vmem:[#allocation7 + $0x40] sm:$0x77]  ;;  %v520_v25 = vmov 4  }
  0x3d   :  { %382 = vset.pattern.permute.xlu0 %v517_v11  ;;  %384 = vset.pattern.permute.xlu1 %v518_v14  ;;  %v167_v24 = vsel %vm165_vm1, %v166_v21, 0  ;;  %v352_v26 = vcombine.high %v114_v23, %v114_v23  ;;  %v408_v27 = vld [vmem:[#allocation5 + $0x20] ss:$8 sps:$4 sm:$0xff]   ;;  %v351_v29 = vcombine.low %v114_v23, %v114_v23  ;;  %v103_v30 = vld [vmem:[#allocation5 + $0x30] sm:$0xff]  ;;  %vm254_vm2 = vcmask 1043456   ;;  %s522_s2 = smov [#allocation8]  }
  0x3e   :  { %66 = vperm.xlu0 %382, %v64_v5   ;;  %82 = vperm.xlu1 %384, %v80_v9   ;;  %v404_v28 = vld [vmem:[#allocation7 + $0x30] ss:$8 sps:$4 sm:$0xff]   ;;  %v361_v32 = vcombine.high %v103_v30, %v103_v30  ;;  %v360_v33 = vcombine.low %v103_v30, %v103_v30  ;;  %vm160_vm3 = vcmask 564224   ;;  %v57_v39 = vand.u32 127, %v56_v38  ;;  %s328_s21 = sshll.u32 %s522_s2, 4  ;;  %s329_s21 = int_to_ptr.vmem [resolvable:$true] %s328_s21 }
  0x3f   :  { %177 = vmatpush1.bf16.msra.mxu1 %v392_v8  ;;  %264 = vmatpush1.bf16.msra.mxu0 %v403_v18  ;;  %v172_v31 = vand.u32 %v352_v26, %v167_v24  ;;  %v169_v35 = vand.u32 %v351_v29, %v167_v24  ;;  %v521_v43 = vmov 0.0   ;;  %vm250_vm9 = vcmask 457728   ;;  %s482_s22 = scalar_lea.vmem %s329_s21, 256  ;;  %p487_p11 = scmp.lt.s32.totalorder %s329_s21, %s329_s21 }
  0x40   :  { %178 = vmatprep.subr.bf16.mxu1 %v395_v12  ;;  %265 = vmatprep.subr.bf16.mxu0 %v405_v22  ;;  %v256_v36 = vsel %vm254_vm2, %v360_v33, 0  ;;  %v302_v5 = vadd.s32 128, %v57_v39  ;;  %vm320_vm11 = vcmask 523264   ;;  %p483_p10 = scmp.ne.s32.totalorder %s329_s21, %s482_s22  ;;  %p488_p12 = scmp.lt.s32.totalorder %s482_s22, %s482_s22 }
  0x42   :  { %386 = vset.pattern.permute.xlu0 %v520_v25  ;;  %385 = vset.pattern.permute.xlu1 %v520_v25  ;;  %vm304_vm10 = vcmp.ge.s32.totalorder %v302_v5, 160  ;;  %p489_p13 = por %p488_p12, %p487_p11 }
  0x43   :  { %179 = vmatpush1.bf16.msra.mxu1 %v398_v17  ;;  %90 = vperm.xlu1 %385, %v88_v16  }
  0x44   :  { %180 = vmatprep.subr.bf16.mxu1 %v401_v19  ;;  %266 = vmatpush1.bf16.msra.mxu0 %v408_v27  ;;  %p490_p0 = pnand %p489_p13, %p483_p10 }
  0x45   :  { %362 = vmatprep.subr.msk.bf16.mxu0 %vm254_vm2, %v361_v32 }
  0x47   :  { %181 = vmatpush1.bf16.msra.mxu1 %v404_v28 }
  0x48   :  { %182 = vmatprep.subr.bf16.mxu1 %v172_v31  ;;  %268 = vmatpush1.bf16.msra.mxu0 %v256_v36 }
  0x4b   :  { %183 = vmatpush1.bf16.msra.mxu1 %v169_v35 }
  0x4e   :  { %353 = vmatmul.mubr.msk.bf16.vlgmr.msra.gmra.mrb[0].mxu1 %vm160_vm3, %v105_v37 }
  0xb8   :  { %v60_v40 = vpop.permute.xlu0 %59  ;;  %v75_v41 = vpop.permute.xlu1 %74 }
  0xb9   :  { %vm61_vm4 = vcmp.eq.s32.totalorder %v57_v39, %v60_v40  ;;  %vm76_vm5 = vcmp.eq.s32.totalorder %v57_v39, %v75_v41 }
  0xba   :  { %v338_v44 = vsel %vm61_vm4, 1.0, %v521_v43  ;;  %v340_v48 = vsel %vm76_vm5, 1.0, %v521_v43 }
  0xbd   :  { %v67_v42 = vpop.permute.xlu0 %66  ;;  %v83_v46 = vpop.permute.xlu1 %82 }
  0xbe   :  { %vm68_vm6 = vcmp.eq.s32.totalorder %v57_v39, %v67_v42  ;;  %vm84_vm7 = vcmp.eq.s32.totalorder %v57_v39, %v83_v46 }
  0xbf   :  { %v339_v45 = vsel %vm68_vm6, 1.0, %v521_v43  ;;  %v341_v50 = vsel %vm84_vm7, 1.0, %v521_v43 }
  0xc0   :  { %v71_v47 = vadd.f32 %v339_v45, %v338_v44 }
  0xc2   :  { %v79_v49 = vadd.f32 %v340_v48, %v71_v47  ;;  %v91_v52 = vpop.permute.xlu1 %90 }
  0xc3   :  { %vm92_vm8 = vcmp.eq.s32.totalorder %v57_v39, %v91_v52 }
  0xc4   :  { %v87_v51 = vadd.f32 %v341_v50, %v79_v49  ;;  %v342_v53 = vsel %vm92_vm8, 1.0, %v521_v43 }
  0xc6   :  { %v95_v54 = vadd.f32 %v342_v53, %v87_v51 }
  0xc8   :  { %v96_v55 = vpack.c.bf16 %v95_v54, %v95_v54 }
  0xca   :  { %363 = vmatmul.mubr.msk.bf16.vlgmr.msra.gmra.mrb[0].mxu0 %vm250_vm9, %v96_v55 }
 0x121   :  { %v208_v56 = vpop.f32.mrb[0].mxu1 }
 0x122   :  { %v210_v57 = vpop.f32.mrb[1].mxu1 }
 0x123   :  { %v212_v58 = vpop.f32.mrb[2].mxu1 }
 0x124   :  { %v213_v59 = vpop.f32.mrb[3].mxu1 }
 0x19d   :  { %v295_v60 = vpop.f32.mrb[0].mxu0 }
 0x19e   :  { %v296_v61 = vadd.f32 %v295_v60, %v208_v56  ;;  %v297_v62 = vpop.f32.mrb[1].mxu0 }
 0x19f   :  { %v298_v63 = vadd.f32 %v297_v62, %v210_v57  ;;  %v299_v0 = vpop.f32.mrb[2].mxu0 }
 0x1a0   :  { %319 = vst [vmem:[#allocation8] sm:$0xff] %v296_v61  ;;  %v300_v1 = vpop.f32.mrb[3].mxu0 }
 0x1a1   :  { %v365_v2 = vmul.f32 -1.442695, %v298_v63 }
 0x1a3   :  { %412 = vpow2.f32 %v365_v2 }
 0x1ad   :  { %v413_v3 = vpop.eup %412 }
 0x1ae   :  { %v312_v4 = vadd.f32 1.0, %v413_v3 }
 0x1b0   :  { %414 = vrcp.f32 %v312_v4 }
 0x1ba   :  { %v415_v6 = vpop.eup %414 }
 0x1bb   :  { %v318_v7 = vsel %vm304_vm10, %v415_v6, %v298_v63 }
 0x1bc   :  { %321 = vst.msk [vmem:[#allocation8 + $0x8] sm:$0xff] %vm320_vm11, %v318_v7 }
 0x1bd   :  { %493 = shalt.err (!%p490_p0)
}
 0x1be   :  { %s494_s25 = scalar_lea.hbm %s608_s3, 256 }
 0x1bf   :  { %p495_p1 = scmp.ne.s32.totalorder %s608_s3, %s494_s25  ;;  %p498_p2 = scmp.lt.u32.totalorder %s494_s25, %s608_s3 }
 0x1c1   :  { %p500_p3 = pnand %p498_p2, %p495_p1 }
 0x1c3   :  { %503 = shalt.err (!%p500_p3)
}
 0x1c4   :  { %331 = dma.vmem_to_hbm [thread:$0]  %s329_s21, 256, %s608_s3, [#allocation4]  }
 0x1c5   :  { %508 = dma.done.wait [#allocation4], 256  }
 0x1c6   :  { %509 = vsyncadd [#allocation4], 4294967040 }
 0x1c7   :  { %335 = vsyncpa [#allocation3], 1 }
 0x1c8   :  { %336 = vsyncpa [#allocation6], 1 }
 0x1c9   :  { %337 = vsyncpa [#allocation4], 1 }

</bundles_post_ra>
